<compile_context>
chip_gen: v7x
topology: tpu7x:2x2x1
jax: 0.10.0
libtpu: 0.0.40
codegen_flags: <defaults>
</compile_context>

<pallas_src>
import functools

import jax
import jax.numpy as jnp
from jax.experimental import pallas as pl
from jax.experimental.pallas import tpu as pltpu

LANE = 128
SUBLANE = 8


def _round_up(x, m):
    return (x + m - 1) // m * m


def cnn_kernel(emb_ref, wcat_ref, fcw_ref, fcb_ref, out_ref, *,
               filter_sizes, num_filters, seq_len):
    """Fused conv(k,E) -> max-over-time -> concat -> fc for one batch tile."""
    F = num_filters
    L = seq_len
    rows = emb_ref.shape[0]
    TB = rows // L

    # One fused MXU matmul covering every (conv group, tap) pair, f32 accum.
    y = jnp.dot(emb_ref[...], wcat_ref[...],
                preferred_element_type=jnp.float32)            # [TB*L, S_pad]
    y = y.reshape(TB, L, -1)

    # Reconstruct each Conv2d(k, E) as k shifted views of the fused result,
    # then max-over-time.  Conv biases were folded into the fc bias host-side.
    pooled = []
    off = 0
    for k in filter_sizes:
        T = L - k + 1
        acc = y[:, 0:T, off:off + F]
        for j in range(1, k):
            acc = acc + y[:, j:j + T, off + j * F:off + (j + 1) * F]
        pooled.append(jnp.max(acc, axis=1))                    # [TB, F]
        off += k * F
    feat = jnp.concatenate(pooled, axis=1)                     # [TB, n_conv*F]

    # Dropout (p=0.5) is eval-mode identity here.
    # TODO(synk): training-mode dropout mask (pltpu.prng_random_bits) not implemented.
    logits = jnp.dot(feat, fcw_ref[...], preferred_element_type=jnp.float32)
    out_ref[...] = (logits + fcb_ref[...]).astype(out_ref.dtype)


def _pack_params(params, filter_sizes, compute_dtype):
    """Host-side weight packing: transpose, fuse, fold biases, lane-pad N dims."""
    E = params['embedding'].shape[1]
    F = params['conv0_w'].shape[0]
    C = params['fc_w'].shape[0]
    n_conv = len(filter_sizes)

    S = sum(filter_sizes) * F
    S_pad = _round_up(S, LANE)
    C_pad = _round_up(C, LANE)

    # Fused conv weight slab: columns grouped as (conv i, tap j, filter f),
    # pre-transposed to [E, F] per tap -> no in-kernel transpose.  Only the
    # N dim is padded; the K dim (E) stays unpadded to keep HBM traffic lean.
    cols = [params[f'conv{i}_w'][:, j, :].T
            for i, k in enumerate(filter_sizes) for j in range(k)]
    w_cat = jnp.concatenate(cols, axis=1)                      # [E, S]
    w_cat = jnp.pad(w_cat, ((0, 0), (0, S_pad - S))).astype(compute_dtype)

    # Single packed fc weight [n_conv*F, C_pad] (one dot in-kernel, no splits).
    fc_w = jnp.pad(params['fc_w'].T,
                   ((0, 0), (0, C_pad - C))).astype(jnp.float32)

    # Fold conv biases into the fc bias: max_t(conv + b) == max_t(conv) + b.
    b_cat = jnp.concatenate([params[f'conv{i}_b'] for i in range(n_conv)],
                            axis=1)                            # [1, n_conv*F]
    fc_b = params['fc_b'] + b_cat @ params['fc_w'].T           # [1, C]
    fc_b = jnp.pad(fc_b, ((0, 0), (0, C_pad - C))).astype(jnp.float32)

    emb_tbl = params['embedding'].astype(compute_dtype)        # [V, E] unpadded
    return emb_tbl, w_cat, fc_w, fc_b, (E, S_pad, C_pad, F, C)


def _pick_batch_block(B, L, E, S_pad, C_pad, itemsize,
                      vmem_budget_bytes=32 << 20):
    """Batch tile sized against the FULL per-tile VMEM working set."""
    E_vmem = _round_up(E, LANE)                # VMEM lane-pads the emb tile
    per_sample = (2 * L * E_vmem * itemsize    # double-buffered emb block
                  + 2 * L * S_pad * 4          # matmul-result temp + shift/acc
                  + 2 * C_pad * 4)             # double-buffered out block
    cap = max(SUBLANE, (vmem_budget_bytes // per_sample) // SUBLANE * SUBLANE)
    # Aim for >= 2 grid programs so v7x can shard the batch across both TCs.
    half = _round_up(max(1, (B + 1) // 2), SUBLANE)
    return min(cap, half)


def cnn_forward(tokens, params, filter_sizes, *, compute_dtype=jnp.bfloat16):
    """Forward pass matching CNN.forward (eval mode)."""
    filter_sizes = tuple(filter_sizes)
    B, L = tokens.shape
    n_conv = len(filter_sizes)

    emb_tbl, w_cat, fc_w, fc_b, (E, S_pad, C_pad, F, C) = _pack_params(
        params, filter_sizes, compute_dtype)

    itemsize = jnp.dtype(compute_dtype).itemsize
    TB = _pick_batch_block(B, L, E, S_pad, C_pad, itemsize)
    B_pad = _round_up(B, TB)
    if B_pad != B:
        # Pad with token 0 (padding_idx); padded rows are sliced off below.
        tokens = jnp.pad(tokens, ((0, B_pad - B), (0, 0)))

    # Embedding gather (glue); activations presented flat & lane-dense [B*L, E]
    # so the kernel needs no input reshape and HBM carries no E padding.
    emb = jnp.take(emb_tbl, tokens.reshape(-1), axis=0)        # [B_pad*L, E]

    rows = TB * L
    grid = (B_pad // TB,)

    # Explicit scoped-VMEM budget: block buffers + matmul temps + weights.
    emb_blk = rows * _round_up(E, LANE) * itemsize
    y_tmp = rows * S_pad * 4
    out_blk = _round_up(TB, SUBLANE) * C_pad * 4
    w_res = (_round_up(E, SUBLANE) * S_pad * itemsize
             + _round_up(n_conv * F, SUBLANE) * C_pad * 4
             + SUBLANE * C_pad * 4)
    vmem_limit = int(min(48 << 20,
                         max(16 << 20,
                             2 * (emb_blk + out_blk + w_res)
                             + 2 * y_tmp + (8 << 20))))

    kernel = functools.partial(cnn_kernel, filter_sizes=filter_sizes,
                               num_filters=F, seq_len=L)

    out = pl.pallas_call(
        kernel,
        out_shape=jax.ShapeDtypeStruct((B_pad, C_pad), jnp.float32),
        grid=grid,
        in_specs=[
            pl.BlockSpec((rows, E), lambda i: (i, 0)),          # activations
            pl.BlockSpec((E, S_pad), lambda i: (0, 0)),         # fused conv W
            pl.BlockSpec((n_conv * F, C_pad), lambda i: (0, 0)),  # packed fc W
            pl.BlockSpec((1, C_pad), lambda i: (0, 0)),         # folded fc bias
        ],
        out_specs=pl.BlockSpec((TB, C_pad), lambda i: (i, 0)),
        compiler_params=pltpu.CompilerParams(
            dimension_semantics=("parallel",),
            vmem_limit_bytes=vmem_limit),
    )(emb, w_cat, fc_w, fc_b)

    return out[:B, :C]


def make_params(key, vocab_size, embedding_dim, num_filters, filter_sizes,
                num_classes):
    keys = jax.random.split(key, 2 + 2 * len(filter_sizes) + 2)
    params = {}
    emb = 0.1 * jax.random.normal(keys[0], (vocab_size, embedding_dim),
                                  jnp.float32)
    params['embedding'] = emb.at[0].set(0.0)  # padding_idx=0 -> zero row
    for i, k in enumerate(filter_sizes):
        params[f'conv{i}_w'] = 0.1 * jax.random.normal(
            keys[1 + 2 * i], (num_filters, k, embedding_dim), jnp.float32)
        params[f'conv{i}_b'] = 0.1 * jax.random.normal(
            keys[2 + 2 * i], (1, num_filters), jnp.float32)
    params['fc_w'] = 0.1 * jax.random.normal(
        keys[-2], (num_classes, len(filter_sizes) * num_filters), jnp.float32)
    params['fc_b'] = 0.1 * jax.random.normal(
        keys[-1], (1, num_classes), jnp.float32)
    return params


def reference_forward(tokens, params, filter_sizes):
    """Pure-JAX reference mirroring the PyTorch forward (eval mode)."""
    emb = jnp.take(params['embedding'], tokens, axis=0)        # [B, L, E]
    L = emb.shape[1]
    pooled = []
    for i, k in enumerate(filter_sizes):
        w = params[f'conv{i}_w']                               # [F, k, E]
        b = params[f'conv{i}_b']                               # [1, F]
        T = L - k + 1
        acc = 0.0
        for j in range(k):
            acc = acc + jnp.einsum('bte,fe->btf', emb[:, j:j + T, :], w[:, j, :])
        acc = acc + b[None, :, :]
        pooled.append(jnp.max(acc, axis=1))
    feat = jnp.concatenate(pooled, axis=1)
    return feat @ params['fc_w'].T + params['fc_b']


if __name__ == "__main__":
    # Small, module-consistent shapes.
    vocab_size = 32
    embedding_dim = 32
    num_filters = 16
    filter_sizes = (2, 3, 4)
    num_classes = 2
    batch = 4
    seq_len = 16

    key = jax.random.PRNGKey(0)
    k_params, k_tokens = jax.random.split(key)
    params = make_params(k_params, vocab_size, embedding_dim, num_filters,
                         filter_sizes, num_classes)
    tokens = jax.random.randint(k_tokens, (batch, seq_len), 0, vocab_size,
                                dtype=jnp.int32)

    ref = jax.block_until_ready(reference_forward(tokens, params, filter_sizes))

    # f32 path: matches PyTorch numerics exactly.
    out_f32 = jax.block_until_ready(
        cnn_forward(tokens, params, filter_sizes, compute_dtype=jnp.float32))
    assert out_f32.shape == (batch, num_classes)
    assert jnp.allclose(out_f32, ref, atol=1e-4, rtol=1e-4), (out_f32, ref)

    # Default path: bf16 operands (halves the mem-bound emb stream), f32 accum.
    out_bf16 = jax.block_until_ready(cnn_forward(tokens, params, filter_sizes))
    assert out_bf16.shape == (batch, num_classes)
    assert jnp.allclose(out_bf16, ref, atol=5e-2, rtol=5e-2), (out_bf16, ref)

    print("KERNEL_OK")
</pallas_src>

<mosaic_0001>
module attributes {stable_mosaic.version = 11 : i64} {
  func.func @cnn_kernel(%arg0: i32, %arg1: memref<128x32xf32, #tpu.memory_space<vmem>>, %arg2: memref<32x256xf32, #tpu.memory_space<vmem>>, %arg3: memref<48x128xf32, #tpu.memory_space<vmem>>, %arg4: memref<1x128xf32, #tpu.memory_space<vmem>>, %arg5: memref<8x128xf32, #tpu.memory_space<vmem>>) attributes {dimension_semantics = [#tpu.dimension_semantics<parallel>], iteration_bounds = array<i64: 1>, scalar_prefetch = 0 : i64, scratch_operands = 0 : i64, tpu.core_type = #tpu.core_type<tc>, window_params = [{transform_indices = @transform_0, window_bounds = array<i64: 128, 32>}, {pipeline_mode = #tpu.pipeline_mode<synchronous>, transform_indices = @transform_1, window_bounds = array<i64: 32, 256>}, {pipeline_mode = #tpu.pipeline_mode<synchronous>, transform_indices = @transform_2, window_bounds = array<i64: 48, 128>}, {pipeline_mode = #tpu.pipeline_mode<synchronous>, transform_indices = @transform_3, window_bounds = array<i64: 1, 128>}, {transform_indices = @transform_4, window_bounds = array<i64: 8, 128>}]} {
    %c0 = arith.constant 0 : index
    %c0_0 = arith.constant 0 : index
    %0 = vector.load %arg1[%c0, %c0_0] : memref<128x32xf32, #tpu.memory_space<vmem>>, vector<128x32xf32>
    %c0_1 = arith.constant 0 : index
    %c0_2 = arith.constant 0 : index
    %1 = vector.load %arg2[%c0_1, %c0_2] : memref<32x256xf32, #tpu.memory_space<vmem>>, vector<32x256xf32>
    %cst = arith.constant dense<0.000000e+00> : vector<128x256xf32>
    %2 = tpu.matmul %0, %1, %cst {dimension_numbers = #tpu.dot_dimension_numbers<[1], [0], [0], [1], [0, 0, 1, 1], [], []>} : vector<128x32xf32>, vector<32x256xf32>, vector<128x256xf32> -> vector<128x256xf32>
    %3 = vector.shape_cast %2 : vector<128x256xf32> to vector<8x16x256xf32>
    %4 = vector.extract_strided_slice %3 {offsets = [0, 0, 0], sizes = [8, 15, 16], strides = [1, 1, 1]} : vector<8x16x256xf32> to vector<8x15x16xf32>
    %5 = vector.extract_strided_slice %3 {offsets = [0, 1, 16], sizes = [8, 15, 16], strides = [1, 1, 1]} : vector<8x16x256xf32> to vector<8x15x16xf32>
    %6 = arith.addf %4, %5 : vector<8x15x16xf32>
    %cst_3 = arith.constant dense<0xFF800000> : vector<8x16xf32>
    %7 = vector.multi_reduction <maximumf>, %6, %cst_3 [1] : vector<8x15x16xf32> to vector<8x16xf32>
    %8 = vector.extract_strided_slice %3 {offsets = [0, 0, 32], sizes = [8, 14, 16], strides = [1, 1, 1]} : vector<8x16x256xf32> to vector<8x14x16xf32>
    %9 = vector.extract_strided_slice %3 {offsets = [0, 1, 48], sizes = [8, 14, 16], strides = [1, 1, 1]} : vector<8x16x256xf32> to vector<8x14x16xf32>
    %10 = arith.addf %8, %9 : vector<8x14x16xf32>
    %11 = vector.extract_strided_slice %3 {offsets = [0, 2, 64], sizes = [8, 14, 16], strides = [1, 1, 1]} : vector<8x16x256xf32> to vector<8x14x16xf32>
    %12 = arith.addf %10, %11 : vector<8x14x16xf32>
    %cst_4 = arith.constant dense<0xFF800000> : vector<8x16xf32>
    %13 = vector.multi_reduction <maximumf>, %12, %cst_4 [1] : vector<8x14x16xf32> to vector<8x16xf32>
    %14 = vector.extract_strided_slice %3 {offsets = [0, 0, 80], sizes = [8, 13, 16], strides = [1, 1, 1]} : vector<8x16x256xf32> to vector<8x13x16xf32>
    %15 = vector.extract_strided_slice %3 {offsets = [0, 1, 96], sizes = [8, 13, 16], strides = [1, 1, 1]} : vector<8x16x256xf32> to vector<8x13x16xf32>
    %16 = arith.addf %14, %15 : vector<8x13x16xf32>
    %17 = vector.extract_strided_slice %3 {offsets = [0, 2, 112], sizes = [8, 13, 16], strides = [1, 1, 1]} : vector<8x16x256xf32> to vector<8x13x16xf32>
    %18 = arith.addf %16, %17 : vector<8x13x16xf32>
    %19 = vector.extract_strided_slice %3 {offsets = [0, 3, 128], sizes = [8, 13, 16], strides = [1, 1, 1]} : vector<8x16x256xf32> to vector<8x13x16xf32>
    %20 = arith.addf %18, %19 : vector<8x13x16xf32>
    %cst_5 = arith.constant dense<0xFF800000> : vector<8x16xf32>
    %21 = vector.multi_reduction <maximumf>, %20, %cst_5 [1] : vector<8x13x16xf32> to vector<8x16xf32>
    %22 = tpu.concatenate %7, %13, %21 in 1 : vector<8x16xf32>, vector<8x16xf32>, vector<8x16xf32> -> vector<8x48xf32>
    %c0_6 = arith.constant 0 : index
    %c0_7 = arith.constant 0 : index
    %23 = vector.load %arg3[%c0_6, %c0_7] : memref<48x128xf32, #tpu.memory_space<vmem>>, vector<48x128xf32>
    %cst_8 = arith.constant dense<0.000000e+00> : vector<8x128xf32>
    %24 = tpu.matmul %22, %23, %cst_8 {dimension_numbers = #tpu.dot_dimension_numbers<[1], [0], [0], [1], [0, 0, 1, 1], [], []>} : vector<8x48xf32>, vector<48x128xf32>, vector<8x128xf32> -> vector<8x128xf32>
    %c0_9 = arith.constant 0 : index
    %c0_10 = arith.constant 0 : index
    %25 = vector.load %arg4[%c0_9, %c0_10] : memref<1x128xf32, #tpu.memory_space<vmem>>, vector<1x128xf32>
    %26 = vector.broadcast %25 : vector<1x128xf32> to vector<8x128xf32>
    %27 = arith.addf %24, %26 : vector<8x128xf32>
    %c0_11 = arith.constant 0 : index
    %c0_12 = arith.constant 0 : index
    %28 = vector.load %arg5[%c0_11, %c0_12] : memref<8x128xf32, #tpu.memory_space<vmem>>, vector<8x128xf32>
    tpu.vector_store %arg5[%c0_11, %c0_12], %27 {strides = array<i32>} : memref<8x128xf32, #tpu.memory_space<vmem>>, vector<8x128xf32>,
    return
  }
  func.func @transform_0(%arg0: i32) -> (i32, i32) {
    %c0_i32 = arith.constant 0 : i32
    %c0_i32_0 = arith.constant 0 : i32
    return %arg0, %c0_i32 : i32, i32
  }
  func.func @transform_1(%arg0: i32) -> (i32, i32) {
    %c0_i32 = arith.constant 0 : i32
    %c0_i32_0 = arith.constant 0 : i32
    %c0_i32_1 = arith.constant 0 : i32
    return %c0_i32, %c0_i32_0 : i32, i32
  }
  func.func @transform_2(%arg0: i32) -> (i32, i32) {
    %c0_i32 = arith.constant 0 : i32
    %c0_i32_0 = arith.constant 0 : i32
    %c0_i32_1 = arith.constant 0 : i32
    return %c0_i32, %c0_i32_0 : i32, i32
  }
  func.func @transform_3(%arg0: i32) -> (i32, i32) {
    %c0_i32 = arith.constant 0 : i32
    %c0_i32_0 = arith.constant 0 : i32
    %c0_i32_1 = arith.constant 0 : i32
    return %c0_i32, %c0_i32_0 : i32, i32
  }
  func.func @transform_4(%arg0: i32) -> (i32, i32) {
    %c0_i32 = arith.constant 0 : i32
    %c0_i32_0 = arith.constant 0 : i32
    return %arg0, %c0_i32 : i32, i32
  }
}

</mosaic_0001>

<bundles_post_ra>
// kernel: tpu_custom_call.1
= control target key start
LH: loop header
LB: loop body
LE: loop exit
PB: predicated region body
PF: predicated region fallthrough
CT: control target
= control target key end

     0   :  { %v1028_v7 = vmov 0.0   ;;  %vm42_vm0 = vcmask 261120   ;;  %s1581_s0 = inlined_call_operand.vmem [shape: f32[128,32], index: 0, kind: input, shape index: {}]   ;;  %s1582_s1 = inlined_call_operand.vmem [shape: f32[32,256], index: 1, kind: input, shape index: {}]   ;;  %s1583_s2 = inlined_call_operand.vmem [shape: f32[48,128], index: 2, kind: input, shape index: {}]   ;;  %s1584_s3 = inlined_call_operand.vmem [shape: f32[1,128], index: 3, kind: input, shape index: {}]   ;;  %s1585_s4 = inlined_call_operand.hbm [shape: f32[8,128], index: 4, kind: output, shape index: {}]  }
   0x1   :  { %v35_v0 = vld [vmem:[%s1582_s1 + $0x8] sm:$0xff]  ;;  %v37_v1 = vld [vmem:[%s1582_s1 + $0x18] sm:$0xff]  ;;  %v34_v2 = vld [vmem:[%s1582_s1] sm:$0xff]  ;;  %155 = vmatprep.mubr.f32.mxu0 %v1028_v7  ;;  %209 = vmatprep.mubr.f32.mxu1 %v1028_v7 }
   0x2   :  { %v976_v3 = vpack.c.bf16 %v37_v1, %v35_v0  ;;  %v36_v4 = vld [vmem:[%s1582_s1 + $0x10] sm:$0xff]  ;;  %v39_v5 = vld [vmem:[%s1582_s1 + $0x28] sm:$0xff]  ;;  %v41_v6 = vld [vmem:[%s1582_s1 + $0x38] sm:$0xff] }
   0x3   :  { %v978_v8 = vpack.c.bf16 %v36_v4, %v34_v2  ;;  %v980_v9 = vpack.c.bf16 %v41_v6, %v39_v5  ;;  %v38_v10 = vld [vmem:[%s1582_s1 + $0x20] sm:$0xff]  ;;  %v40_v11 = vld [vmem:[%s1582_s1 + $0x30] sm:$0xff]  ;;  %v27_v14 = vld [vmem:[%s1581_s0 + $0x48] sm:$0xff] }
   0x4   :  { %977 = vmatprep.subr.bf16.mxu0 %v976_v3  ;;  %993 = vmatprep.subr.bf16.mxu1 %v976_v3  ;;  %v982_v12 = vpack.c.bf16 %v40_v11, %v38_v10  ;;  %v18_v13 = vld [vmem:[%s1581_s0] sm:$0xff] }
   0x5   :  { %979 = vmatpush1.bf16.msra.mxu0 %v978_v8  ;;  %995 = vmatpush1.bf16.msra.mxu1 %v978_v8 }
   0x6   :  { %981 = vmatprep.subr.bf16.mxu0 %v980_v9  ;;  %994 = vmatprep.subr.bf16.mxu1 %v980_v9 }
   0x9   :  { %983 = vmatpush1.bf16.msra.mxu0 %v982_v12  ;;  %996 = vmatpush1.bf16.msra.mxu1 %v982_v12 }
   0xa   :  { %9 = vsyncpa [#allocation3], 0  ;;  %v19_v15 = vld [vmem:[%s1581_s0 + $0x8] sm:$0xff]  ;;  %v28_v16 = vld [vmem:[%s1581_s0 + $0x50] sm:$0xff]  ;;  %s1029_s9 = smov 112   ;;  %vm268_vm1 = vcmask 1046528  }
   0xb   :  { %v20_v17 = vld [vmem:[%s1581_s0 + $0x10] sm:$0xff]  ;;  %v29_v18 = vld [vmem:[%s1581_s0 + $0x58] sm:$0xff]  ;;  %v30_v20 = vld [vmem:[%s1581_s0 + $0x60] sm:$0xff]  ;;  %vm431_vm2 = vcmask 1045504   ;;  %vm610_vm3 = vcmask 1044480   ;;  %s1031_s10 = smov 80  }
   0xc   :  { %936 = vmatmul.mubr.msk.f32.vlgmr.msra.gmra.mrb[0].mxu0 %vm42_vm0, %v18_v13  ;;  %945 = vmatmul.mubr.msk.f32.vlgmr.msra.gmra.mrb[0].mxu1 %vm42_vm0, %v27_v14  ;;  %v21_v19 = vld [vmem:[%s1581_s0 + $0x18] sm:$0xff]  ;;  %v22_v21 = vld [vmem:[%s1581_s0 + $0x20] sm:$0xff]  ;;  %v31_v22 = vld [vmem:[%s1581_s0 + $0x68] sm:$0xff]  ;;  %vm357_vm4 = vcmask 130048   ;;  %vm359_vm5 = vcmask 129024   ;;  %vm520_vm6 = vcmask 392448  }
   0xd   :  { %161 = vmatprep.mubr.f32.mxu0 %v1028_v7  ;;  %215 = vmatprep.mubr.f32.mxu1 %v1028_v7  ;;  %v23_v23 = vld [vmem:[%s1581_s0 + $0x28] sm:$0xff]  ;;  %v32_v24 = vld [vmem:[%s1581_s0 + $0x70] sm:$0xff]  ;;  %v33_v26 = vld [vmem:[%s1581_s0 + $0x78] sm:$0xff]  ;;  %vm522_vm7 = vcmask 390400   ;;  %vm699_vm8 = vcmask 786048   ;;  %vm701_vm9 = vcmask 782976  }
   0xe   :  { %v24_v25 = vld [vmem:[%s1581_s0 + $0x30] sm:$0xff]  ;;  %v25_v27 = vld [vmem:[%s1581_s0 + $0x38] sm:$0xff]  ;;  %v26_v28 = vld [vmem:[%s1581_s0 + $0x40] sm:$0xff]  ;;  %s1030_s0 = smov 96   ;;  %vm781_vm10 = vcmask 1041409   ;;  %vm783_vm11 = vcmask 1042434  }
   0xf   :  { %vm785_vm12 = vcmask 1043459   ;;  %vm787_vm13 = vcmask 1044484   ;;  %vm789_vm14 = vcmask 1045509   ;;  %vm791_vm15 = vcmask 1046534   ;;  %s1034_s24 = smov [#allocation2]  }
  0x10   :  { %937 = vmatmul.mubr.msk.f32.gmra.mrb[2].mxu0 %vm42_vm0, %v19_v15  ;;  %946 = vmatmul.mubr.msk.f32.gmra.mrb[2].mxu1 %vm42_vm0, %v28_v16  ;;  %s928_s25 = sshll.u32 %s1034_s24, 4  ;;  %s929_s25 = int_to_ptr.vmem [resolvable:$true] %s928_s25 }
  0x11   :  { %167 = vmatprep.mubr.f32.mxu0 %v1028_v7  ;;  %221 = vmatprep.mubr.f32.mxu1 %v1028_v7  ;;  %s1004_s26 = scalar_lea.vmem %s929_s25, 128  ;;  %p1009_p1 = scmp.lt.s32.totalorder %s929_s25, %s929_s25 }
  0x12   :  { %p1005_p0 = scmp.ne.s32.totalorder %s929_s25, %s1004_s26  ;;  %p1010_p2 = scmp.lt.s32.totalorder %s1004_s26, %s1004_s26 }
  0x14   :  { %938 = vmatmul.mubr.msk.f32.gmra.mrb[4].mxu0 %vm42_vm0, %v20_v17  ;;  %947 = vmatmul.mubr.msk.f32.gmra.mrb[4].mxu1 %vm42_vm0, %v29_v18  ;;  %p1011_p3 = por %p1010_p2, %p1009_p1 }
  0x15   :  { %173 = vmatprep.mubr.f32.mxu0 %v1028_v7  ;;  %227 = vmatprep.mubr.f32.mxu1 %v1028_v7 }
  0x16   :  { %p1012_p4 = pnand %p1011_p3, %p1005_p0 }
  0x18   :  { %939 = vmatmul.mubr.msk.f32.gmra.mrb[6].mxu0 %vm42_vm0, %v21_v19  ;;  %948 = vmatmul.mubr.msk.f32.gmra.mrb[6].mxu1 %vm42_vm0, %v30_v20 }
  0x19   :  { %179 = vmatprep.mubr.f32.mxu0 %v1028_v7  ;;  %233 = vmatprep.mubr.f32.mxu1 %v1028_v7 }
  0x1c   :  { %940 = vmatmul.mubr.msk.f32.gmra.mrb[8].mxu0 %vm42_vm0, %v22_v21  ;;  %949 = vmatmul.mubr.msk.f32.gmra.mrb[8].mxu1 %vm42_vm0, %v31_v22 }
  0x1d   :  { %185 = vmatprep.mubr.f32.mxu0 %v1028_v7  ;;  %239 = vmatprep.mubr.f32.mxu1 %v1028_v7 }
  0x20   :  { %941 = vmatmul.mubr.msk.f32.gmra.mrb[10].mxu0 %vm42_vm0, %v23_v23  ;;  %950 = vmatmul.mubr.msk.f32.gmra.mrb[10].mxu1 %vm42_vm0, %v32_v24 }
  0x21   :  { %191 = vmatprep.mubr.f32.mxu0 %v1028_v7  ;;  %245 = vmatprep.mubr.f32.mxu1 %v1028_v7 }
  0x24   :  { %942 = vmatmul.mubr.msk.f32.gmra.mrb[12].mxu0 %vm42_vm0, %v24_v25  ;;  %951 = vmatmul.mubr.msk.f32.gmra.mrb[12].mxu1 %vm42_vm0, %v33_v26 }
  0x25   :  { %197 = vmatprep.mubr.f32.mxu0 %v1028_v7 }
  0x28   :  { %943 = vmatmul.mubr.msk.f32.gmra.mrb[14].mxu0 %vm42_vm0, %v25_v27 }
  0x29   :  { %203 = vmatprep.mubr.f32.mxu0 %v1028_v7 }
  0x2c   :  { %944 = vmatmul.mubr.msk.f32.gmra.mrb[16].mxu0 %vm42_vm0, %v26_v28 }
  0xdf   :  { %v1164_v29 = vpop.f32.mrb[0].mxu0  ;;  %v1166_v30 = vpop.f32.mrb[0].mxu1 }
  0xe0   :  { %v159_v31 = vpop.f32.mrb[1].mxu0  ;;  %v282_v32 = vrot.slane %v1166_v30, 1  ;;  %v1169_v33 = vpop.f32.mrb[1].mxu1  ;;  %v445_v34 = vrot.slane %v1166_v30, 2  ;;  %v269_v37 = vrot.slane %v1164_v29, 1  ;;  %v432_v38 = vrot.slane %v1164_v29, 2 }
  0xe1   :  { %v611_v43 = vrot.slane %v159_v31, 3  ;;  %v624_v53 = vrot.slane %v1169_v33, 3  ;;  %v835_v33 = vld [vmem:[%s1583_s2 + $0x8] sm:$0xff] }
  0xe2   :  { %311 = vrot.lane.b32.xlu1 %v282_v32, %s1029_s9 }
  0xe3   :  { %v1175_v35 = vpop.f32.mrb[2].mxu0  ;;  %v1177_v36 = vpop.f32.mrb[2].mxu1 }
  0xe4   :  { %v433_v39 = vrot.slane %v1175_v35, 2  ;;  %v165_v40 = vpop.f32.mrb[3].mxu0  ;;  %v270_v41 = vrot.slane %v1175_v35, 1  ;;  %v219_v42 = vpop.f32.mrb[3].mxu1  ;;  %v284_v46 = vrot.slane %v1177_v36, 1  ;;  %v447_v47 = vrot.slane %v1177_v36, 2 }
  0xe5   :  { %v612_v44 = vrot.slane %v165_v40, 3  ;;  %v626_v49 = vrot.slane %v219_v42, 3 }
  0xe6   :  { %474 = vrot.lane.b32.xlu1 %v445_v34, %s1030_s0  ;;  %295 = vrot.lane.b32.xlu0 %v270_v41, %s1029_s9  ;;  %v271_v45 = vsel %vm268_vm1, %v269_v37, %v270_v41  ;;  %v434_v48 = vsel %vm431_vm2, %v432_v38, %v433_v39 }
  0xe7   :  { %v1191_v50 = vpop.f32.mrb[4].mxu1  ;;  %v613_v51 = vsel %vm610_vm3, %v611_v43, %v612_v44  ;;  %v1194_v52 = vpop.f32.mrb[4].mxu0 }
  0xe8   :  { %v285_v54 = vrot.slane %v1191_v50, 1  ;;  %v448_v55 = vrot.slane %v1191_v50, 2  ;;  %v1199_v56 = vpop.f32.mrb[5].mxu1  ;;  %v171_v57 = vpop.f32.mrb[5].mxu0  ;;  %v272_v59 = vrot.slane %v1194_v52, 1  ;;  %v435_v60 = vrot.slane %v1194_v52, 2 }
  0xe9   :  { %v627_v58 = vrot.slane %v1199_v56, 3  ;;  %v614_v63 = vrot.slane %v171_v57, 3 }
  0xea   :  { %653 = vrot.lane.b32.xlu1 %v624_v53, %s1031_s10  ;;  %293 = vrot.lane.b32.xlu0 %v271_v45, %s1029_s9  ;;  %v286_v61 = vsel %vm268_vm1, %v284_v46, %v285_v54  ;;  %v449_v62 = vsel %vm431_vm2, %v447_v47, %v448_v55 }
  0xeb   :  { %v1212_v0 = vpop.f32.mrb[6].mxu0  ;;  %v1217_v1 = vsel %vm610_vm3, %v626_v49, %v627_v58  ;;  %v1219_v2 = vpop.f32.mrb[6].mxu1 }
  0xec   :  { %v273_v3 = vrot.slane %v1212_v0, 1  ;;  %v436_v4 = vrot.slane %v1212_v0, 2  ;;  %v1223_v5 = vpop.f32.mrb[7].mxu0  ;;  %v231_v6 = vpop.f32.mrb[7].mxu1  ;;  %v287_v9 = vrot.slane %v1219_v2, 1  ;;  %v450_v10 = vrot.slane %v1219_v2, 2 }
  0xed   :  { %v615_v8 = vrot.slane %v1223_v5, 3  ;;  %v629_v14 = vrot.slane %v231_v6, 3 }
  0xee   :  { %458 = vrot.lane.b32.xlu1 %v433_v39, %s1030_s0  ;;  %456 = vrot.lane.b32.xlu0 %v434_v48, %s1030_s0  ;;  %v1233_v11 = vsel %vm431_vm2, %v435_v60, %v436_v4  ;;  %v1238_v12 = vsel %vm268_vm1, %v272_v59, %v273_v3 }
  0xef   :  { %v1240_v13 = vpop.f32.mrb[8].mxu0  ;;  %v1242_v15 = vpop.f32.mrb[8].mxu1  ;;  %v1247_v16 = vsel %vm610_vm3, %v614_v63, %v615_v8 }
  0xf0   :  { %v183_v17 = vpop.f32.mrb[9].mxu0  ;;  %v288_v18 = vrot.slane %v1242_v15, 1  ;;  %v451_v19 = vrot.slane %v1242_v15, 2  ;;  %v1251_v20 = vpop.f32.mrb[9].mxu1  ;;  %v275_v22 = vrot.slane %v1240_v13, 1  ;;  %v438_v23 = vrot.slane %v1240_v13, 2 }
  0xf1   :  { %v630_v21 = vrot.slane %v1251_v20, 3  ;;  %v617_v26 = vrot.slane %v183_v17, 3 }
  0xf2   :  { %637 = vrot.lane.b32.xlu1 %v612_v44, %s1031_s10  ;;  %635 = vrot.lane.b32.xlu0 %v613_v51, %s1031_s10  ;;  %v289_v24 = vsel %vm268_vm1, %v287_v9, %v288_v18  ;;  %v452_v25 = vsel %vm431_vm2, %v450_v10, %v451_v19 }
  0xf3   :  { %v1264_v27 = vpop.f32.mrb[10].mxu0  ;;  %v631_v28 = vsel %vm610_vm3, %v629_v14, %v630_v21  ;;  %v1269_v31 = vpop.f32.mrb[10].mxu1 }
  0xf4   :  { %v276_v37 = vrot.slane %v1264_v27, 1  ;;  %v439_v38 = vrot.slane %v1264_v27, 2  ;;  %v189_v39 = vpop.f32.mrb[11].mxu0  ;;  %v243_v40 = vpop.f32.mrb[11].mxu1  ;;  %v290_v43 = vrot.slane %v1269_v31, 1  ;;  %v453_v44 = vrot.slane %v1269_v31, 2 }
  0xf5   :  { %v618_v41 = vrot.slane %v189_v39, 3  ;;  %v632_v47 = vrot.slane %v243_v40, 3 }
  0xf6   :  { %315 = vrot.lane.b32.xlu1 %v285_v54, %s1029_s9  ;;  %313 = vrot.lane.b32.xlu0 %v286_v61, %s1029_s9  ;;  %v277_v42 = vsel %vm268_vm1, %v275_v22, %v276_v37  ;;  %v440_v45 = vsel %vm431_vm2, %v438_v23, %v439_v38 }
  0xf7   :  { %v1279_v46 = vpop.f32.mrb[12].mxu0  ;;  %v1281_v48 = vpop.f32.mrb[12].mxu1  ;;  %v619_v49 = vsel %vm610_vm3, %v617_v26, %v618_v41 }
  0xf8   :  { %v195_v51 = vpop.f32.mrb[13].mxu0  ;;  %v291_v54 = vrot.slane %v1281_v48, 1  ;;  %v454_v57 = vrot.slane %v1281_v48, 2  ;;  %v249_v59 = vpop.f32.mrb[13].mxu1  ;;  %v278_v61 = vrot.slane %v1279_v46, 1  ;;  %v441_v63 = vrot.slane %v1279_v46, 2 }
  0xf9   :  { %v633_v60 = vrot.slane %v249_v59, 3  ;;  %v620_v10 = vrot.slane %v195_v51, 3 }
  0xfa   :  { %478 = vrot.lane.b32.xlu1 %v448_v55, %s1030_s0  ;;  %476 = vrot.lane.b32.xlu0 %v449_v62, %s1030_s0  ;;  %v292_v6 = vsel %vm268_vm1, %v290_v43, %v291_v54  ;;  %v455_v9 = vsel %vm431_vm2, %v453_v44, %v454_v57 }
  0xfb   :  { %v1294_v14 = vpop.f32.mrb[14].mxu0  ;;  %v634_v17 = vsel %vm610_vm3, %v632_v47, %v633_v60 }
  0xfc   :  { %v279_v22 = vrot.slane %v1294_v14, 1  ;;  %v442_v23 = vrot.slane %v1294_v14, 2  ;;  %v201_v55 = vpop.f32.mrb[15].mxu0 }
  0xfd   :  { %v621_v26 = vrot.slane %v201_v55, 3 }
  0xfe   :  { %657 = vrot.lane.b32.xlu1 %v627_v58, %s1031_s10  ;;  %655 = vrot.lane.b32.xlu0 %v1217_v1, %s1031_s10  ;;  %v280_v62 = vsel %vm268_vm1, %v278_v61, %v279_v22  ;;  %v443_v39 = vsel %vm431_vm2, %v441_v63, %v442_v23 }
  0xff   :  { %v1306_v40 = vpop.f32.mrb[16].mxu0  ;;  %v622_v43 = vsel %vm610_vm3, %v620_v10, %v621_v26 }
 0x100   :  { %v281_v44 = vrot.slane %v1306_v40, 1  ;;  %v444_v47 = vrot.slane %v1306_v40, 2  ;;  %v207_v51 = vpop.f32.mrb[17].mxu0 }
 0x101   :  { %v623_v59 = vrot.slane %v207_v51, 3 }
 0x102   :  { %460 = vrot.lane.b32.xlu0 %v1233_v11, %s1030_s0  ;;  %299 = vrot.lane.b32.xlu1 %v273_v3, %s1029_s9  ;;  %v283_v56 = vsel %vm268_vm1, %v281_v44, %v282_v32  ;;  %v446_v58 = vsel %vm431_vm2, %v444_v47, %v445_v34  ;;  %v834_v32 = vld [vmem:[%s1583_s2] sm:$0xff]  ;;  %v836_v34 = vld [vmem:[%s1583_s2 + $0x10] sm:$0xff]  ;;  %vm793_vm1 = vcmask 1047559   ;;  %vm1033_vm2 = vmmov 0  }
 0x103   :  { %v625_v1 = vsel %vm610_vm3, %v623_v59, %v624_v53  ;;  %v1032_v53 = vmov 0.0|0.0   ;;  %v985_v3 = vpack.c.bf16 %v835_v33, %v834_v32  ;;  %v839_v11 = vld [vmem:[%s1583_s2 + $0x28] sm:$0xff]  ;;  %973 = vmatprep.mubr.msk.f32.mxu1 %vm1033_vm2, %v1028_v7  ;;  %vm847_vm3 = vcmask 392192  }
 0x104   :  { %984 = vmatprep.subr.bf16.mxu1 %v1032_v53 }
 0x105   :  { %986 = vmatpush3.bf16.msra.mxu1 %v985_v3 }
 0x106   :  { %462 = vrot.lane.b32.xlu1 %v436_v4, %s1030_s0  ;;  %639 = vrot.lane.b32.xlu0 %v1247_v16, %s1031_s10  ;;  %v837_v4 = vld [vmem:[%s1583_s2 + $0x18] sm:$0xff] }
 0x107   :  { %v988_v5 = vpack.c.bf16 %v837_v4, %v836_v34  ;;  %987 = vmatprep.subr.bf16.mxu1 %v1032_v53 }
 0x109   :  { %989 = vmatpush3.bf16.msra.mxu1 %v988_v5 }
 0x10a   :  { %297 = vrot.lane.b32.xlu1 %v1238_v12, %s1029_s9  ;;  %317 = vrot.lane.b32.xlu0 %v289_v24, %s1029_s9 }
 0x10b   :  { %990 = vmatprep.subr.bf16.mxu1 %v1032_v53 }
 0x10e   :  { %641 = vrot.lane.b32.xlu1 %v615_v8, %s1031_s10  ;;  %480 = vrot.lane.b32.xlu0 %v452_v25, %s1030_s0  ;;  %v838_v8 = vld [vmem:[%s1583_s2 + $0x20] sm:$0xff] }
 0x10f   :  { %v991_v12 = vpack.c.bf16 %v839_v11, %v838_v8 }
 0x111   :  { %992 = vmatpush3.bf16.msra.mxu1 %v991_v12 }
 0x112   :  { %319 = vrot.lane.b32.xlu1 %v288_v18, %s1029_s9  ;;  %659 = vrot.lane.b32.xlu0 %v631_v28, %s1031_s10 }
 0x116   :  { %482 = vrot.lane.b32.xlu1 %v451_v19, %s1030_s0  ;;  %301 = vrot.lane.b32.xlu0 %v277_v42, %s1029_s9 }
 0x11a   :  { %661 = vrot.lane.b32.xlu1 %v630_v21, %s1031_s10  ;;  %464 = vrot.lane.b32.xlu0 %v440_v45, %s1030_s0 }
 0x11e   :  { %303 = vrot.lane.b32.xlu1 %v276_v37, %s1029_s9  ;;  %643 = vrot.lane.b32.xlu0 %v619_v49, %s1031_s10 }
 0x122   :  { %466 = vrot.lane.b32.xlu1 %v439_v38, %s1030_s0  ;;  %321 = vrot.lane.b32.xlu0 %v292_v6, %s1029_s9 }
 0x126   :  { %645 = vrot.lane.b32.xlu1 %v618_v41, %s1031_s10  ;;  %484 = vrot.lane.b32.xlu0 %v455_v9, %s1030_s0 }
 0x12a   :  { %323 = vrot.lane.b32.xlu1 %v291_v54, %s1029_s9  ;;  %305 = vrot.lane.b32.xlu0 %v280_v62, %s1029_s9 }
 0x12e   :  { %486 = vrot.lane.b32.xlu1 %v454_v57, %s1030_s0  ;;  %468 = vrot.lane.b32.xlu0 %v443_v39, %s1030_s0 }
 0x132   :  { %307 = vrot.lane.b32.xlu1 %v279_v22, %s1029_s9  ;;  %647 = vrot.lane.b32.xlu0 %v622_v43, %s1031_s10 }
 0x136   :  { %470 = vrot.lane.b32.xlu1 %v442_v23, %s1030_s0  ;;  %309 = vrot.lane.b32.xlu0 %v283_v56, %s1029_s9 }
 0x13a   :  { %649 = vrot.lane.b32.xlu1 %v621_v26, %s1031_s10  ;;  %472 = vrot.lane.b32.xlu0 %v446_v58, %s1030_s0 }
 0x13e   :  { %665 = vrot.lane.b32.xlu1 %v633_v60, %s1031_s10  ;;  %651 = vrot.lane.b32.xlu0 %v625_v1, %s1031_s10 }
 0x142   :  { %663 = vrot.lane.b32.xlu0 %v634_v17, %s1031_s10 }
 0x154   :  { %v312_v16 = vpop.permute.xlu1 %311 }
 0x155   :  { %v1387_v18 = vadd.f32 %v312_v16, %v1166_v30 }
 0x158   :  { %v475_v19 = vpop.permute.xlu1 %474  ;;  %v296_v20 = vpop.permute.xlu0 %295 }
 0x159   :  { %v1390_v21 = vadd.f32 %v475_v19, %v1387_v18  ;;  %v342_v24 = vadd.f32 %v296_v20, %v1175_v35 }
 0x15b   :  { %v360_v41 = vsel %vm359_vm5, %v342_v24, -inf }
 0x15c   :  { %v654_v25 = vpop.permute.xlu1 %653  ;;  %v294_v28 = vpop.permute.xlu0 %293 }
 0x15d   :  { %v1394_v37 = vadd.f32 %v654_v25, %v1390_v21  ;;  %v341_v38 = vadd.f32 %v294_v28, %v1164_v29 }
 0x15f   :  { %v358_v30 = vsel %vm357_vm4, %v341_v38, -inf }
 0x160   :  { %v361_v42 = vmax.f32 %v358_v30, %v360_v41  ;;  %v459_v45 = vpop.permute.xlu1 %458  ;;  %v457_v49 = vpop.permute.xlu0 %456 }
 0x161   :  { %v505_v54 = vadd.f32 %v459_v45, %v342_v24  ;;  %v504_v57 = vadd.f32 %v457_v49, %v341_v38 }
 0x162   :  { %v362_v4 = vrot.slane %v361_v42, 4 }
 0x163   :  { %v523_v35 = vsel %vm522_vm7, %v505_v54, -inf  ;;  %v521_v60 = vsel %vm520_vm6, %v504_v57, -inf }
 0x164   :  { %v524_v61 = vmax.f32 %v521_v60, %v523_v35  ;;  %v638_v63 = vpop.permute.xlu1 %637  ;;  %v636_v29 = vpop.permute.xlu0 %635  ;;  %v363_v12 = vmax.f32 %v361_v42, %v362_v4 }
 0x165   :  { %v684_v6 = vadd.f32 %v638_v63, %v505_v54  ;;  %v683_v9 = vadd.f32 %v636_v29, %v504_v57 }
 0x166   :  { %v525_v20 = vrot.slane %v524_v61, 4  ;;  %v364_v28 = vrot.slane %v363_v12, 2 }
 0x167   :  { %v702_v10 = vsel %vm701_vm9, %v684_v6, -inf  ;;  %v700_v17 = vsel %vm699_vm8, %v683_v9, -inf }
 0x168   :  { %v703_v22 = vmax.f32 %v700_v17, %v702_v10  ;;  %v316_v23 = vpop.permute.xlu1 %315  ;;  %v314_v55 = vpop.permute.xlu0 %313  ;;  %v526_v49 = vmax.f32 %v524_v61, %v525_v20  ;;  %v365_v42 = vmax.f32 %v363_v12, %v364_v28 }
 0x169   :  { %v352_v26 = vadd.f32 %v316_v23, %v1191_v50  ;;  %v351_v62 = vadd.f32 %v314_v55, %v1177_v36 }
 0x16a   :  { %v704_v24 = vrot.slane %v703_v22, 4  ;;  %v527_v23 = vrot.slane %v526_v49, 2 }
 0x16b   :  { %v405_v39 = vsel %vm359_vm5, %v352_v26, -inf  ;;  %v404_v43 = vsel %vm357_vm4, %v351_v62, -inf }
 0x16c   :  { %v1407_v44 = vmax.f32 %v404_v43, %v405_v39  ;;  %v479_v47 = vpop.permute.xlu1 %478  ;;  %v477_v51 = vpop.permute.xlu0 %476  ;;  %v705_v54 = vmax.f32 %v703_v22, %v704_v24 }
 0x16d   :  { %v515_v59 = vadd.f32 %v479_v47, %v352_v26  ;;  %v514_v56 = vadd.f32 %v477_v51, %v351_v62 }
 0x16e   :  { %v706_v61 = vrot.slane %v705_v54, 2 }
 0x16f   :  { %v568_v58 = vsel %vm522_vm7, %v515_v59, -inf  ;;  %v567_v1 = vsel %vm520_vm6, %v514_v56, -inf }
 0x170   :  { %v1411_v32 = vmax.f32 %v567_v1, %v568_v58  ;;  %v658_v33 = vpop.permute.xlu1 %657  ;;  %v656_v50 = vpop.permute.xlu0 %655  ;;  %v528_v1 = vmax.f32 %v526_v49, %v527_v23 }
 0x171   :  { %v694_v34 = vadd.f32 %v658_v33, %v515_v59  ;;  %v693_v36 = vadd.f32 %v656_v50, %v514_v56  ;;  %v366_v56 = vrot.slane %v365_v42, 1 }
 0x172   :  { %v529_v24 = vrot.slane %v528_v1, 1 }
 0x173   :  { %v747_v53 = vsel %vm701_vm9, %v694_v34, -inf  ;;  %v746_v3 = vsel %vm699_vm8, %v693_v36, -inf  ;;  %v707_v36 = vmax.f32 %v705_v54, %v706_v61 }
 0x174   :  { %v1415_v5 = vmax.f32 %v746_v3, %v747_v53  ;;  %v461_v8 = vpop.permute.xlu0 %460  ;;  %v300_v11 = vpop.permute.xlu1 %299 }
 0x175   :  { %v344_v25 = vadd.f32 %v300_v11, %v1212_v0 }
 0x177   :  { %v369_v57 = vsel %vm359_vm5, %v344_v25, -inf }
 0x178   :  { %v463_v16 = vpop.permute.xlu1 %462  ;;  %v640_v19 = vpop.permute.xlu0 %639 }
 0x179   :  { %v507_v30 = vadd.f32 %v463_v16, %v344_v25 }
 0x17b   :  { %v532_v9 = vsel %vm522_vm7, %v507_v30, -inf }
 0x17c   :  { %v298_v38 = vpop.permute.xlu1 %297  ;;  %v318_v41 = vpop.permute.xlu0 %317 }
 0x17d   :  { %v343_v45 = vadd.f32 %v298_v38, %v1194_v52  ;;  %v353_v22 = vadd.f32 %v318_v41, %v1219_v2  ;;  %v367_v38 = vmax.f32 %v365_v42, %v366_v56  ;;  %v708_v41 = vrot.slane %v707_v36, 1 }
 0x17f   :  { %v368_v35 = vsel %vm357_vm4, %v343_v45, -inf  ;;  %v506_v60 = vadd.f32 %v461_v8, %v343_v45  ;;  %v413_v53 = vsel %vm357_vm4, %v353_v22, -inf }
 0x180   :  { %v370_v63 = vmax.f32 %v368_v35, %v369_v57  ;;  %v642_v29 = vpop.permute.xlu1 %641  ;;  %v481_v6 = vpop.permute.xlu0 %480 }
 0x181   :  { %v531_v0 = vsel %vm520_vm6, %v506_v60, -inf  ;;  %v685_v10 = vadd.f32 %v640_v19, %v506_v60  ;;  %v686_v17 = vadd.f32 %v642_v29, %v507_v30  ;;  %v516_v2 = vadd.f32 %v481_v6, %v353_v22 }
 0x182   :  { %v371_v55 = vrot.slane %v370_v63, 4  ;;  %v533_v52 = vmax.f32 %v531_v0, %v532_v9  ;;  %v530_v9 = vmax.f32 %v528_v1, %v529_v24 }
 0x183   :  { %v710_v26 = vsel %vm699_vm8, %v685_v10, -inf  ;;  %v711_v62 = vsel %vm701_vm9, %v686_v17, -inf  ;;  %v576_v35 = vsel %vm520_vm6, %v516_v2, -inf }
 0x184   :  { %v372_v39 = vmax.f32 %v370_v63, %v371_v55  ;;  %v534_v43 = vrot.slane %v533_v52, 4  ;;  %v712_v47 = vmax.f32 %v710_v26, %v711_v62  ;;  %v320_v51 = vpop.permute.xlu1 %319  ;;  %v660_v59 = vpop.permute.xlu0 %659 }
 0x185   :  { %v354_v58 = vadd.f32 %v320_v51, %v1242_v15  ;;  %v695_v30 = vadd.f32 %v660_v59, %v516_v2 }
 0x186   :  { %v373_v33 = vrot.slane %v372_v39, 2  ;;  %v535_v50 = vmax.f32 %v533_v52, %v534_v43  ;;  %v713_v34 = vrot.slane %v712_v47, 4  ;;  %v709_v52 = vmax.f32 %v707_v36, %v708_v41 }
 0x187   :  { %v414_v3 = vsel %vm359_vm5, %v354_v58, -inf  ;;  %v755_v17 = vsel %vm699_vm8, %v695_v30, -inf  ;;  %v407_v43 = vrot.slane %v1407_v44, 4 }
 0x188   :  { %v374_v4 = vmax.f32 %v372_v39, %v373_v33  ;;  %v536_v8 = vrot.slane %v535_v50, 2  ;;  %v714_v11 = vmax.f32 %v712_v47, %v713_v34  ;;  %v415_v12 = vmax.f32 %v413_v53, %v414_v3  ;;  %v483_v16 = vpop.permute.xlu1 %482  ;;  %v302_v19 = vpop.permute.xlu0 %301 }
 0x189   :  { %v517_v20 = vadd.f32 %v483_v16, %v354_v58  ;;  %v345_v23 = vadd.f32 %v302_v19, %v1240_v13  ;;  %v570_v34 = vrot.slane %v1411_v32, 4 }
 0x18a   :  { %v375_v15 = vrot.slane %v374_v4, 1  ;;  %v537_v25 = vmax.f32 %v535_v50, %v536_v8  ;;  %v715_v28 = vrot.slane %v714_v11, 2  ;;  %v408_v50 = vmax.f32 %v1407_v44, %v407_v43 }
 0x18b   :  { %v577_v45 = vsel %vm522_vm7, %v517_v20, -inf  ;;  %v377_v13 = vsel %vm357_vm4, %v345_v23, -inf  ;;  %v416_v2 = vrot.slane %v415_v12, 4  ;;  %v571_v24 = vmax.f32 %v1411_v32, %v570_v34 }
 0x18c   :  { %v376_v49 = vmax.f32 %v374_v4, %v375_v15  ;;  %v538_v54 = vrot.slane %v537_v25, 1  ;;  %v716_v57 = vmax.f32 %v714_v11, %v715_v28  ;;  %v662_v60 = vpop.permute.xlu1 %661  ;;  %v465_v63 = vpop.permute.xlu0 %464  ;;  %v1431_v29 = vmax.f32 %v576_v35, %v577_v45 }
 0x18d   :  { %v696_v6 = vadd.f32 %v662_v60, %v517_v20  ;;  %v508_v59 = vadd.f32 %v465_v63, %v345_v23  ;;  %v409_v20 = vrot.slane %v408_v50, 2  ;;  %v749_v44 = vrot.slane %v1415_v5, 4 }
 0x18e   :  { %v539_v0 = vmax.f32 %v537_v25, %v538_v54  ;;  %v1434_v10 = vsel %vm781_vm10, %v376_v49, %v367_v38  ;;  %v717_v42 = vrot.slane %v716_v57, 1  ;;  %v417_v38 = vmax.f32 %v415_v12, %v416_v2 }
 0x18f   :  { %v756_v55 = vsel %vm701_vm9, %v696_v6, -inf  ;;  %v1462_v49 = vsel %vm359_vm5, %v1387_v18, -inf  ;;  %v1466_v63 = vsel %vm522_vm7, %v1390_v21, -inf  ;;  %v410_v12 = vmax.f32 %v408_v50, %v409_v20 }
 0x190   :  { %v718_v61 = vmax.f32 %v716_v57, %v717_v42  ;;  %v1439_v22 = vmax.f32 %v755_v17, %v756_v55  ;;  %v304_v26 = vpop.permute.xlu1 %303  ;;  %v644_v62 = vpop.permute.xlu0 %643  ;;  %v1442_v39 = vsel %vm781_vm10, %v539_v0, %v530_v9  ;;  %v572_v6 = vrot.slane %v571_v24, 2 }
 0x191   :  { %v346_v47 = vadd.f32 %v304_v26, %v1264_v27  ;;  %v540_v27 = vsel %vm520_vm6, %v508_v59, -inf  ;;  %v687_v3 = vadd.f32 %v644_v62, %v508_v59  ;;  %v418_v18 = vrot.slane %v417_v38, 2 }
 0x192   :  { %v1447_v51 = vsel %vm781_vm10, %v718_v61, %v709_v52 }
 0x193   :  { %v378_v56 = vsel %vm359_vm5, %v346_v47, -inf  ;;  %v719_v41 = vsel %vm699_vm8, %v687_v3, -inf  ;;  %v419_v2 = vmax.f32 %v417_v38, %v418_v18 }
 0x194   :  { %v379_v58 = vmax.f32 %v377_v13, %v378_v56  ;;  %v467_v1 = vpop.permute.xlu1 %466  ;;  %v322_v33 = vpop.permute.xlu0 %321  ;;  %v411_v13 = vrot.slane %v410_v12, 1 }
 0x195   :  { %v509_v36 = vadd.f32 %v467_v1, %v346_v47  ;;  %v355_v30 = vadd.f32 %v322_v33, %v1269_v31  ;;  %v750_v31 = vmax.f32 %v1415_v5, %v749_v44  ;;  %v579_v5 = vrot.slane %v1431_v29, 4 }
 0x196   :  { %v380_v53 = vrot.slane %v379_v58, 4 }
 0x197   :  { %v541_v4 = vsel %vm522_vm7, %v509_v36, -inf  ;;  %v422_v23 = vsel %vm357_vm4, %v355_v30, -inf  ;;  %v751_v56 = vrot.slane %v750_v31, 2 }
 0x198   :  { %v381_v8 = vmax.f32 %v379_v58, %v380_v53  ;;  %v542_v11 = vmax.f32 %v540_v27, %v541_v4  ;;  %v646_v16 = vpop.permute.xlu1 %645  ;;  %v485_v19 = vpop.permute.xlu0 %484 }
 0x199   :  { %v688_v15 = vadd.f32 %v646_v16, %v509_v36  ;;  %v1471_v55 = vadd.f32 %v485_v19, %v355_v30  ;;  %v1492_v16 = vmax.f32 %v410_v12, %v411_v13  ;;  %v580_v19 = vmax.f32 %v1431_v29, %v579_v5 }
 0x19a   :  { %v382_v25 = vrot.slane %v381_v8, 2  ;;  %v543_v28 = vrot.slane %v542_v11, 4  ;;  %v420_v29 = vrot.slane %v419_v2, 1 }
 0x19b   :  { %v720_v45 = vsel %vm701_vm9, %v688_v15, -inf  ;;  %v585_v50 = vsel %vm520_vm6, %v1471_v55, -inf }
 0x19c   :  { %v383_v54 = vmax.f32 %v381_v8, %v382_v25  ;;  %v544_v57 = vmax.f32 %v542_v11, %v543_v28  ;;  %v721_v32 = vmax.f32 %v719_v41, %v720_v45  ;;  %v324_v35 = vpop.permute.xlu1 %323  ;;  %v306_v60 = vpop.permute.xlu0 %305  ;;  %v1504_v41 = vmax.f32 %v750_v31, %v751_v56 }
 0x19d   :  { %v356_v9 = vadd.f32 %v324_v35, %v1281_v48  ;;  %v1474_v48 = vmax.f32 %v571_v24, %v572_v6  ;;  %v347_v36 = vadd.f32 %v306_v60, %v1279_v46  ;;  %v758_v46 = vrot.slane %v1439_v22, 4 }
 0x19e   :  { %v384_v0 = vrot.slane %v383_v54, 1  ;;  %v545_v42 = vrot.slane %v544_v57, 2  ;;  %v722_v17 = vrot.slane %v721_v32, 4  ;;  %v1517_v18 = vmax.f32 %v419_v2, %v420_v29 }
 0x19f   :  { %v423_v52 = vsel %vm359_vm5, %v356_v9, -inf  ;;  %v574_v25 = vrot.slane %v1474_v48, 1  ;;  %v1508_v60 = vmax.f32 %v1439_v22, %v758_v46 }
 0x1a0   :  { %v385_v61 = vmax.f32 %v383_v54, %v384_v0  ;;  %v546_v26 = vmax.f32 %v544_v57, %v545_v42  ;;  %v723_v21 = vmax.f32 %v721_v32, %v722_v17  ;;  %v424_v62 = vmax.f32 %v422_v23, %v423_v52  ;;  %v487_v43 = vpop.permute.xlu1 %486  ;;  %v469_v47 = vpop.permute.xlu0 %468 }
 0x1a1   :  { %v1477_v59 = vadd.f32 %v487_v43, %v356_v9  ;;  %v510_v15 = vadd.f32 %v469_v47, %v347_v36  ;;  %v581_v57 = vrot.slane %v580_v19, 2  ;;  %v760_v43 = vrot.slane %v1508_v60, 2 }
 0x1a2   :  { %v1481_v58 = vsel %vm783_vm11, %v385_v61, %v1434_v10  ;;  %v547_v1 = vrot.slane %v546_v26, 1  ;;  %v724_v33 = vrot.slane %v723_v21, 2  ;;  %v425_v34 = vrot.slane %v424_v62, 4 }
 0x1a3   :  { %v586_v53 = vsel %vm522_vm7, %v1477_v59, -inf  ;;  %v1490_v10 = vsel %vm701_vm9, %v1394_v37, -inf  ;;  %v386_v37 = vsel %vm357_vm4, %v347_v36, -inf  ;;  %v549_v12 = vsel %vm520_vm6, %v510_v15, -inf }
 0x1a4   :  { %v548_v27 = vmax.f32 %v546_v26, %v547_v1  ;;  %v725_v3 = vmax.f32 %v723_v21, %v724_v33  ;;  %v587_v4 = vmax.f32 %v585_v50, %v586_v53  ;;  %v308_v8 = vpop.permute.xlu1 %307  ;;  %v648_v11 = vpop.permute.xlu0 %647  ;;  %v426_v28 = vmax.f32 %v424_v62, %v425_v34 }
 0x1a5   :  { %v348_v20 = vadd.f32 %v308_v8, %v1294_v14  ;;  %v689_v0 = vadd.f32 %v648_v11, %v510_v15  ;;  %v1520_v26 = vmax.f32 %v580_v19, %v581_v57 }
 0x1a6   :  { %v726_v24 = vrot.slane %v725_v3, 1  ;;  %v1499_v44 = vsel %vm783_vm11, %v548_v27, %v1442_v39  ;;  %v588_v32 = vrot.slane %v587_v4, 4  ;;  %v427_v31 = vrot.slane %v426_v28, 2 }
 0x1a7   :  { %v387_v38 = vsel %vm359_vm5, %v348_v20, -inf  ;;  %v728_v1 = vsel %vm699_vm8, %v689_v0, -inf }
 0x1a8   :  { %v727_v30 = vmax.f32 %v725_v3, %v726_v24  ;;  %v388_v14 = vmax.f32 %v386_v37, %v387_v38  ;;  %v471_v45 = vpop.permute.xlu1 %470  ;;  %v310_v54 = vpop.permute.xlu0 %309  ;;  %v589_v21 = vmax.f32 %v587_v4, %v588_v32  ;;  %v428_v56 = vmax.f32 %v426_v28, %v427_v31 }
 0x1a9   :  { %v511_v35 = vadd.f32 %v471_v45, %v348_v20  ;;  %v349_v39 = vadd.f32 %v310_v54, %v1306_v40  ;;  %v583_v3 = vrot.slane %v1520_v26, 1 }
 0x1aa   :  { %v389_v6 = vrot.slane %v388_v14, 4  ;;  %v1513_v9 = vsel %vm783_vm11, %v727_v30, %v1447_v51  ;;  %v590_v4 = vrot.slane %v589_v21, 2  ;;  %v429_v15 = vrot.slane %v428_v56, 1 }
 0x1ab   :  { %v550_v42 = vsel %vm522_vm7, %v511_v35, -inf  ;;  %v395_v17 = vsel %vm357_vm4, %v349_v39, -inf }
 0x1ac   :  { %v390_v40 = vmax.f32 %v388_v14, %v389_v6  ;;  %v551_v23 = vmax.f32 %v549_v12, %v550_v42  ;;  %v397_v22 = vmax.f32 %v395_v17, %v1462_v49  ;;  %v650_v52 = vpop.permute.xlu1 %649  ;;  %v473_v61 = vpop.permute.xlu0 %472  ;;  %v591_v57 = vmax.f32 %v589_v21, %v590_v4 }
 0x1ad   :  { %v690_v51 = vadd.f32 %v650_v52, %v511_v35  ;;  %v512_v62 = vadd.f32 %v473_v61, %v349_v39  ;;  %v430_v21 = vmax.f32 %v428_v56, %v429_v15 }
 0x1ae   :  { %v391_v47 = vrot.slane %v390_v40, 2  ;;  %v552_v13 = vrot.slane %v551_v23, 4  ;;  %v398_v5 = vrot.slane %v397_v22, 4 }
 0x1af   :  { %v729_v33 = vsel %vm701_vm9, %v690_v51, -inf  ;;  %v558_v50 = vsel %vm520_vm6, %v512_v62, -inf }
 0x1b0   :  { %v392_v49 = vmax.f32 %v390_v40, %v391_v47  ;;  %v553_v34 = vmax.f32 %v551_v23, %v552_v13  ;;  %v399_v36 = vmax.f32 %v397_v22, %v398_v5  ;;  %v730_v53 = vmax.f32 %v728_v1, %v729_v33  ;;  %v666_v2 = vpop.permute.xlu1 %665  ;;  %v652_v27 = vpop.permute.xlu0 %651 }
 0x1b1   :  { %v560_v8 = vmax.f32 %v558_v50, %v1466_v63  ;;  %v691_v11 = vadd.f32 %v652_v27, %v512_v62  ;;  %v698_v37 = vadd.f32 %v666_v2, %v1477_v59 }
 0x1b2   :  { %v393_v19 = vrot.slane %v392_v49, 1  ;;  %v554_v20 = vrot.slane %v553_v34, 2  ;;  %v400_v46 = vrot.slane %v399_v36, 2  ;;  %v731_v24 = vrot.slane %v730_v53, 4 }
 0x1b3   :  { %v561_v28 = vrot.slane %v560_v8, 4  ;;  %v737_v38 = vsel %vm699_vm8, %v691_v11, -inf  ;;  %v765_v0 = vsel %vm701_vm9, %v698_v37, -inf }
 0x1b4   :  { %v394_v29 = vmax.f32 %v392_v49, %v393_v19  ;;  %v555_v30 = vmax.f32 %v553_v34, %v554_v20  ;;  %v401_v14 = vmax.f32 %v399_v36, %v400_v46  ;;  %v732_v45 = vmax.f32 %v730_v53, %v731_v24  ;;  %v664_v54 = vpop.permute.xlu0 %663 }
 0x1b5   :  { %v562_v63 = vmax.f32 %v560_v8, %v561_v28  ;;  %v739_v32 = vmax.f32 %v737_v38, %v1490_v10  ;;  %v697_v35 = vadd.f32 %v664_v54, %v1471_v55  ;;  %v761_v10 = vmax.f32 %v1508_v60, %v760_v43 }
 0x1b6   :  { %v556_v39 = vrot.slane %v555_v30, 1  ;;  %v402_v12 = vrot.slane %v401_v14, 1  ;;  %v733_v6 = vrot.slane %v732_v45, 2  ;;  %v786_v31 = vsel %vm785_vm12, %v394_v29, %v1481_v58 }
 0x1b7   :  { %v563_v59 = vrot.slane %v562_v63, 2  ;;  %v740_v42 = vrot.slane %v739_v32, 4  ;;  %v764_v17 = vsel %vm699_vm8, %v697_v35, -inf  ;;  %v592_v49 = vrot.slane %v591_v57, 1 }
 0x1b8   :  { %v557_v40 = vmax.f32 %v555_v30, %v556_v39  ;;  %v403_v23 = vmax.f32 %v401_v14, %v402_v12  ;;  %v734_v22 = vmax.f32 %v732_v45, %v733_v6  ;;  %v766_v52 = vmax.f32 %v764_v17, %v765_v0  ;;  %v952_v30 = vld [vmem:[%s1584_s3] ss:$0 sm:$0xff] }
 0x1b9   :  { %v564_v61 = vmax.f32 %v562_v63, %v563_v59  ;;  %v741_v55 = vmax.f32 %v739_v32, %v740_v42  ;;  %v575_v34 = vmax.f32 %v1474_v48, %v574_v25  ;;  %v753_v36 = vrot.slane %v1504_v41, 1 }
 0x1ba   :  { %v735_v51 = vrot.slane %v734_v22, 1  ;;  %v767_v62 = vrot.slane %v766_v52, 4  ;;  %v806_v58 = vsel %vm785_vm12, %v557_v40, %v1499_v44  ;;  %v788_v47 = vsel %vm787_vm13, %v403_v23, %v786_v31 }
 0x1bb   :  { %v565_v13 = vrot.slane %v564_v61, 1  ;;  %v742_v5 = vrot.slane %v741_v55, 2  ;;  %v790_v1 = vsel %vm789_vm14, %v1492_v16, %v788_v47  ;;  %v762_v2 = vrot.slane %v761_v10, 1 }
 0x1bc   :  { %v736_v33 = vmax.f32 %v734_v22, %v735_v51  ;;  %v768_v50 = vmax.f32 %v766_v52, %v767_v62  ;;  %v792_v60 = vsel %vm791_vm15, %v1517_v18, %v790_v1  ;;  %v584_v18 = vmax.f32 %v1520_v26, %v583_v3 }
 0x1bd   :  { %v566_v43 = vmax.f32 %v564_v61, %v565_v13  ;;  %v743_v56 = vmax.f32 %v741_v55, %v742_v5  ;;  %v794_v44 = vsel %vm793_vm1, %v430_v21, %v792_v60  ;;  %v593_v8 = vmax.f32 %v591_v57, %v592_v49 }
 0x1be   :  { %v769_v16 = vrot.slane %v768_v50, 2  ;;  %v824_v53 = vsel %vm785_vm12, %v736_v33, %v1513_v9  ;;  %v754_v48 = vmax.f32 %v1504_v41, %v753_v36  ;;  %v763_v9 = vmax.f32 %v761_v10, %v762_v2 }
 0x1bf   :  { %v744_v27 = vrot.slane %v743_v56, 1  ;;  %v807_v7 = vsel %vm787_vm13, %v566_v43, %v806_v58 }
 0x1c0   :  { %v770_v4 = vmax.f32 %v768_v50, %v769_v16  ;;  %v808_v11 = vsel %vm789_vm14, %v575_v34, %v807_v7 }
 0x1c1   :  { %v745_v19 = vmax.f32 %v743_v56, %v744_v27  ;;  %v809_v20 = vsel %vm791_vm15, %v584_v18, %v808_v11 }
 0x1c2   :  { %v810_v25 = vsel %vm793_vm1, %v593_v8, %v809_v20  ;;  %v771_v46 = vrot.slane %v770_v4, 1 }
 0x1c3   :  { %811 = vrot.lane.b32.xlu0 %v810_v25, %s1029_s9  ;;  %v825_v24 = vsel %vm787_vm13, %v745_v19, %v824_v53 }
 0x1c4   :  { %v772_v26 = vmax.f32 %v770_v4, %v771_v46  ;;  %v826_v3 = vsel %vm789_vm14, %v754_v48, %v825_v24 }
 0x1c5   :  { %v827_v15 = vsel %vm791_vm15, %v763_v9, %v826_v3 }
 0x1c6   :  { %v828_v28 = vsel %vm793_vm1, %v772_v26, %v827_v15 }
 0x1c7   :  { %829 = vrot.lane.b32.xlu1 %v828_v28, %s1031_s10 }
 0x235   :  { %v812_v37 = vpop.permute.xlu0 %811 }
 0x236   :  { %v832_v41 = vsel %vm357_vm4, %v794_v44, %v812_v37 }
 0x239   :  { %v830_v38 = vpop.permute.xlu1 %829 }
 0x23a   :  { %v833_v29 = vsel %vm42_vm0, %v832_v41, %v830_v38 }
 0x23b   :  { %974 = vmatmul.mubr.msk.f32.vlgmr.msra.gmra.mrb[14].mxu1 %vm847_vm3, %v833_v29 }
 0x30e   :  { %v917_v14 = vpop.f32.mrb[14].mxu1 }
 0x30f   :  { %v918_v45 = vadd.f32 %v952_v30, %v917_v14  ;;  %v975_v54 = vpop.f32.mrb[15].mxu1 }
 0x311   :  { %921 = vst [vmem:[#allocation2] sm:$0xff] %v918_v45 }
 0x312   :  { %1015 = shalt.err (!%p1012_p4)
}
 0x313   :  { %s1016_s29 = scalar_lea.hbm %s1585_s4, 128 }
 0x314   :  { %p1017_p5 = scmp.ne.s32.totalorder %s1585_s4, %s1016_s29  ;;  %p1020_p6 = scmp.lt.u32.totalorder %s1016_s29, %s1585_s4 }
 0x316   :  { %p1022_p7 = pnand %p1020_p6, %p1017_p5 }
 0x318   :  { %1025 = shalt.err (!%p1022_p7)
}
 0x319   :  { %931 = dma.vmem_to_hbm [thread:$0]  %s929_s25, 128, %s1585_s4, [#allocation3]  }
 0x31a   :  { %1026 = dma.done.wait [#allocation3], 128  }
 0x31b   :  { %1027 = vsyncadd [#allocation3], 4294967168 }
 0x31c   :  { %935 = vsyncpa [#allocation3], 1 }

</bundles_post_ra>
